<compile_context>
chip_gen: v5e
topology: v5e:2x2
jax: 0.10.0
libtpu: 0.0.40
codegen_flags: <defaults>
</compile_context>

<pallas_src>
import functools

import jax
import jax.numpy as jnp
from jax.experimental import pallas as pl
from jax.experimental.pallas import tpu as pltpu


def _round_up(x: int, m: int) -> int:
    return ((x + m - 1) // m) * m


def linear_logsoftmax_kernel(x_ref, w_ref, b_ref, o_ref, *, n_valid: int):
    # x_ref: [TB, n_in] (native dtype), w_ref: [n_in, n_out_p] (native dtype),
    # b_ref: [1, n_out_p], o_ref: [TB, n_out_p]
    x = x_ref[...]
    w = w_ref[...]
    b = b_ref[...].astype(jnp.float32)

    # Linear: x @ W (already transposed in wrapper). MXU matmul, f32 accumulation,
    # no in-kernel transpose / relayout.
    logits = jnp.dot(x, w, preferred_element_type=jnp.float32) + b  # [TB, n_out_p] f32

    n_out_p = logits.shape[-1]
    if n_valid != n_out_p:
        # Mask padded output lanes so they contribute nothing to the softmax.
        lane = jax.lax.broadcasted_iota(jnp.int32, logits.shape, dimension=1)
        logits = jnp.where(lane < n_valid, logits, jnp.float32(-1e30))

    # Numerically stable LogSoftmax over the last dim (dim=1 in PyTorch terms), in f32.
    m = jnp.max(logits, axis=-1, keepdims=True)
    shifted = logits - m
    lse = jnp.log(jnp.sum(jnp.exp(shifted), axis=-1, keepdims=True))
    o_ref[...] = (shifted - lse).astype(o_ref.dtype)


def my_model_forward(x, w, b, *, block_b: int = 256):
    """x: [B, n_in], w: [n_out, n_in] (PyTorch layout), b: [n_out] -> [B, n_out] log-probs."""
    B, n_in = x.shape
    n_out = w.shape[0]

    # Lane-dense padded output width (multiple of 128).
    n_out_p = _round_up(n_out, 128)

    # Pre-transpose weight ONCE on the wrapper side and zero-pad to the lane-dense width.
    w_t = jnp.zeros((n_in, n_out_p), w.dtype).at[:, :n_out].set(w.T)
    b_p = jnp.zeros((1, n_out_p), b.dtype).at[:, :n_out].set(b.reshape(1, n_out))

    # Batch tile: multiple of 8 sublanes, capped at block_b (sized to fit v7x's 64 MiB VMEM
    # comfortably even with double-buffering).
    TB = min(block_b, _round_up(B, 8))
    B_p = _round_up(B, TB)
    if B_p != B:
        x = jnp.pad(x, ((0, B_p - B), (0, 0)))

    grid = (B_p // TB,)

    kernel = functools.partial(linear_logsoftmax_kernel, n_valid=n_out)

    out = pl.pallas_call(
        kernel,
        out_shape=jax.ShapeDtypeStruct((B_p, n_out_p), x.dtype),
        grid=grid,
        in_specs=[
            pl.BlockSpec((TB, n_in), lambda i: (i, 0)),        # x: tiled over batch
            pl.BlockSpec((n_in, n_out_p), lambda i: (0, 0)),   # weight: full, VMEM-resident
            pl.BlockSpec((1, n_out_p), lambda i: (0, 0)),      # bias: full, VMEM-resident
        ],
        out_specs=pl.BlockSpec((TB, n_out_p), lambda i: (i, 0)),
        compiler_params=pltpu.CompilerParams(
            dimension_semantics=("parallel",),          # batch axis shards across TCs on v7x
            vmem_limit_bytes=32 * 1024 * 1024,          # explicit budget; safe on v5e/v6e/v7x
        ),
    )(x, w_t, b_p)

    # Strip batch / lane padding back to the module's true output shape.
    return out[:B, :n_out]


def _reference(x, w, b):
    logits = x.astype(jnp.float32) @ w.astype(jnp.float32).T + b.astype(jnp.float32)
    return jax.nn.log_softmax(logits, axis=1)


if __name__ == "__main__":
    # Module hyperparameters (from my_model.__init__ defaults)
    n_in, n_out = 2, 4
    batch = 8

    key = jax.random.PRNGKey(0)
    kx, kw, kb = jax.random.split(key, 3)

    # Deterministic synthetic parameters (PyTorch-style uniform(-1/sqrt(n_in), 1/sqrt(n_in)))
    bound = 1.0 / jnp.sqrt(jnp.float32(n_in))
    w = jax.random.uniform(kw, (n_out, n_in), jnp.float32, -bound, bound)
    b = jax.random.uniform(kb, (n_out,), jnp.float32, -bound, bound)

    # Example input
    x = jax.random.normal(kx, (batch, n_in), jnp.float32)

    out = my_model_forward(x, w, b)
    out = jax.block_until_ready(out)

    ref = _reference(x, w, b)
    assert out.shape == (batch, n_out)
    assert jnp.allclose(out, ref, atol=1e-5, rtol=1e-5), "mismatch vs pure-JAX reference"

    print("KERNEL_OK")
</pallas_src>

<mosaic_0001>
module attributes {stable_mosaic.version = 11 : i64} {
  func.func @linear_logsoftmax_kernel(%arg0: i32, %arg1: memref<8x2xf32, #tpu.memory_space<vmem>>, %arg2: memref<2x128xf32, #tpu.memory_space<vmem>>, %arg3: memref<1x128xf32, #tpu.memory_space<vmem>>, %arg4: memref<8x128xf32, #tpu.memory_space<vmem>>) attributes {dimension_semantics = [#tpu.dimension_semantics<parallel>], iteration_bounds = array<i64: 1>, scalar_prefetch = 0 : i64, scratch_operands = 0 : i64, tpu.core_type = #tpu.core_type<tc>, window_params = [{transform_indices = @transform_0, window_bounds = array<i64: 8, 2>}, {pipeline_mode = #tpu.pipeline_mode<synchronous>, transform_indices = @transform_1, window_bounds = array<i64: 2, 128>}, {pipeline_mode = #tpu.pipeline_mode<synchronous>, transform_indices = @transform_2, window_bounds = array<i64: 1, 128>}, {transform_indices = @transform_3, window_bounds = array<i64: 8, 128>}]} {
    %c0 = arith.constant 0 : index
    %c0_0 = arith.constant 0 : index
    %0 = vector.load %arg1[%c0, %c0_0] : memref<8x2xf32, #tpu.memory_space<vmem>>, vector<8x2xf32>
    %c0_1 = arith.constant 0 : index
    %c0_2 = arith.constant 0 : index
    %1 = vector.load %arg2[%c0_1, %c0_2] : memref<2x128xf32, #tpu.memory_space<vmem>>, vector<2x128xf32>
    %c0_3 = arith.constant 0 : index
    %c0_4 = arith.constant 0 : index
    %2 = vector.load %arg3[%c0_3, %c0_4] : memref<1x128xf32, #tpu.memory_space<vmem>>, vector<1x128xf32>
    %cst = arith.constant dense<0.000000e+00> : vector<8x128xf32>
    %3 = tpu.matmul %0, %1, %cst {dimension_numbers = #tpu.dot_dimension_numbers<[1], [0], [0], [1], [0, 0, 1, 1], [], []>} : vector<8x2xf32>, vector<2x128xf32>, vector<8x128xf32> -> vector<8x128xf32>
    %4 = vector.broadcast %2 : vector<1x128xf32> to vector<8x128xf32>
    %5 = arith.addf %3, %4 : vector<8x128xf32>
    %6 = tpu.iota {dimensions = array<i32: 1>} : vector<8x128xi32>
    %c4_i32 = arith.constant 4 : i32
    %7 = vector.broadcast %c4_i32 : i32 to vector<8x128xi32>
    %8 = arith.cmpi slt, %6, %7 : vector<8x128xi32>
    %cst_5 = arith.constant -1.000000e+30 : f32
    %9 = vector.broadcast %cst_5 : f32 to vector<8x128xf32>
    %10 = arith.select %8, %5, %9 : vector<8x128xi1>, vector<8x128xf32>
    %cst_6 = arith.constant dense<0xFF800000> : vector<8xf32>
    %11 = vector.multi_reduction <maximumf>, %10, %cst_6 [1] : vector<8x128xf32> to vector<8xf32>
    %12 = vector.shape_cast %11 : vector<8xf32> to vector<8x1xf32>
    %13 = vector.broadcast %12 : vector<8x1xf32> to vector<8x128xf32>
    %14 = arith.subf %10, %13 : vector<8x128xf32>
    %15 = math.exp %14 : vector<8x128xf32>
    %cst_7 = arith.constant dense<0.000000e+00> : vector<8xf32>
    %16 = vector.multi_reduction <add>, %15, %cst_7 [1] : vector<8x128xf32> to vector<8xf32>
    %17 = vector.shape_cast %16 : vector<8xf32> to vector<8x1xf32>
    %18 = math.log %17 : vector<8x1xf32>
    %19 = vector.broadcast %18 : vector<8x1xf32> to vector<8x128xf32>
    %20 = arith.subf %14, %19 : vector<8x128xf32>
    %c0_8 = arith.constant 0 : index
    %c0_9 = arith.constant 0 : index
    %21 = vector.load %arg4[%c0_8, %c0_9] : memref<8x128xf32, #tpu.memory_space<vmem>>, vector<8x128xf32>
    tpu.vector_store %arg4[%c0_8, %c0_9], %20 {strides = array<i32>} : memref<8x128xf32, #tpu.memory_space<vmem>>, vector<8x128xf32>,
    return
  }
  func.func @transform_0(%arg0: i32) -> (i32, i32) {
    %c0_i32 = arith.constant 0 : i32
    %c0_i32_0 = arith.constant 0 : i32
    return %arg0, %c0_i32 : i32, i32
  }
  func.func @transform_1(%arg0: i32) -> (i32, i32) {
    %c0_i32 = arith.constant 0 : i32
    %c0_i32_0 = arith.constant 0 : i32
    %c0_i32_1 = arith.constant 0 : i32
    return %c0_i32, %c0_i32_0 : i32, i32
  }
  func.func @transform_2(%arg0: i32) -> (i32, i32) {
    %c0_i32 = arith.constant 0 : i32
    %c0_i32_0 = arith.constant 0 : i32
    %c0_i32_1 = arith.constant 0 : i32
    return %c0_i32, %c0_i32_0 : i32, i32
  }
  func.func @transform_3(%arg0: i32) -> (i32, i32) {
    %c0_i32 = arith.constant 0 : i32
    %c0_i32_0 = arith.constant 0 : i32
    return %arg0, %c0_i32 : i32, i32
  }
}

</mosaic_0001>

<bundles_post_ra>
// kernel: tpu_custom_call.1
= control target key start
LH: loop header
LB: loop body
LE: loop exit
PB: predicated region body
PF: predicated region fallthrough
CT: control target
= control target key end

     0   :  { %vm25_vm0 = vcmask 1041408   ;;  %vm21_vm1 = vcmask 15360   ;;  %s147_s0 = inlined_call_operand.vmem [shape: f32[8,2], index: 0, kind: input, shape index: {}]   ;;  %s148_s1 = inlined_call_operand.vmem [shape: f32[2,128], index: 1, kind: input, shape index: {}]   ;;  %s149_s2 = inlined_call_operand.vmem [shape: f32[1,128], index: 2, kind: input, shape index: {}]   ;;  %s150_s3 = inlined_call_operand.hbm [shape: f32[8,128], index: 3, kind: output, shape index: {}]  }
   0x1   :  { %v16_v0 = vld [vmem:[%s148_s1] sm:$0x3] }
   0x2   :  { %v15_v1 = vld [vmem:[%s147_s0] sm:$0xff]  ;;  %80 = vmatpush.msk.msra.mxu0 %vm25_vm0, %v16_v0 }
   0x3   :  { %8 = vsyncpa [#allocation3], 0  ;;  %81 = vmatmul.msk.f32.vlgmr.msra.gmra.mxu0 %vm21_vm1, %v15_v1  ;;  %v49_v2 = vlaneseq  ;;  %v83_v4 = vld [vmem:[%s149_s2] ss:$0 sm:$0xff]  ;;  %s114_s0 = smov [#allocation2]   ;;  %s71_s2 = sshll.u32 %s150_s3, 4  ;;  %s72_s2 = int_to_ptr.hbm [resolvable:$true] %s71_s2 }
   0x4   :  { %s69_s1 = sshll.u32 %s114_s0, 4  ;;  %s70_s1 = int_to_ptr.vmem [resolvable:$true] %s69_s1 }
   0x5   :  { %v50_v3 = vand.u32 127, %v49_v2 }
   0x7   :  { %vm51_vm2 = vcmp.lt.s32.totalorder %v50_v3, 4 }
  0x80   :  { %v46_v5 = vpop.f32.mrf.mxu0 }
  0x81   :  { %v47_v6 = vadd.f32 %v83_v4, %v46_v5 }
  0x83   :  { %v52_v7 = vsel %vm51_vm2, %v47_v6, -1e+30 }
  0x84   :  { %53 = vmax.xlane.f32.xlu0 %v52_v7 }
  0xf7   :  { %v54_v8 = vpop.xlane.xlu0 %53 }
  0xf8   :  { %v55_v9 = vsub.f32 %v52_v7, %v54_v8 }
  0xfa   :  { %v56_v10 = vmul.f32 1.442695, %v55_v9 }
  0xfc   :  { %84 = vpow2.f32 %v56_v10 }
 0x102   :  { %v85_v11 = vpop.eup %84 }
 0x103   :  { %58 = vadd.xlane.f32.xlu0 %v85_v11 }
 0x176   :  { %v59_v12 = vpop.xlane.xlu0 %58 }
 0x177   :  { %86 = vlog2.f32 %v59_v12 }
 0x17d   :  { %v87_v13 = vpop.eup %86 }
 0x17e   :  { %v61_v14 = vmul.f32 0.6931472, %v87_v13 }
 0x180   :  { %v62_v15 = vsub.f32 %v55_v9, %v61_v14 }
 0x182   :  { %63 = vst [vmem:[#allocation2] sm:$0xff] %v62_v15 }
 0x183   :  { %74 = dma.vmem_to_hbm [thread:$0]  %s70_s1, 128, %s72_s2, [#allocation3]  }
 0x184   :  { %112 = dma.done.wait [#allocation3], 128  }
 0x185   :  { %113 = vsyncadd [#allocation3], 4294967168 }
 0x186   :  { %79 = vsyncpa [#allocation3], 1 }

</bundles_post_ra>
